<compile_context>
chip_gen: v7x
topology: tpu7x:2x2x1
jax: 0.10.0
libtpu: 0.0.40
codegen_flags: <defaults>
</compile_context>

<pallas_src>
import jax
import jax.numpy as jnp
from jax.experimental import pallas as pl
from jax.experimental.pallas import tpu as pltpu


def _round_up(n, m):
    return ((n + m - 1) // m) * m


def _residual_fusion_kernel(x_ref, w1_ref, b1_ref, w2_ref, b2_ref, ws_ref, bs_ref, o_ref):
    x = x_ref[...]                                         # (TILE_M, K_in) bf16

    # Shortcut branch: residual = x @ Ws  (f32 accumulate on the MXU).
    residual = jnp.dot(x, ws_ref[...], preferred_element_type=jnp.float32)
    # Fold both biases of the final add into the residual (single f32 VPU pass).
    residual = residual + bs_ref[...] + b2_ref[...]

    # Main branch: h = relu(x @ W1 + b1); bias/ReLU in f32, cast to bf16 for fc2.
    h = jnp.dot(x, w1_ref[...], preferred_element_type=jnp.float32) + b1_ref[...]
    h = jnp.maximum(h, 0.0).astype(jnp.bfloat16)

    # out = relu(h @ W2 + (residual + b2 + bs))
    out = jnp.dot(h, w2_ref[...], preferred_element_type=jnp.float32) + residual
    o_ref[...] = jnp.maximum(out, 0.0).astype(o_ref.dtype)


def _vmem_budget_bytes(tile_m, k_in, k_f, n_out):
    bf16, f32 = 2, 4
    # Resident (double-buffered by Pallas) weights + biases.
    resident = (k_in * k_f + k_f * n_out + k_in * n_out) * bf16 * 2
    resident += (k_f + 2 * n_out) * f32 * 2
    # Double-buffered x / out tiles.
    tiles = 2 * tile_m * k_in * bf16 + 2 * tile_m * n_out * f32
    # In-kernel temporaries (h in f32 + bf16, residual + out in f32).
    interm = tile_m * k_f * (f32 + bf16) + 2 * tile_m * n_out * f32
    budget = resident + tiles + interm + (4 << 20)          # headroom
    return int(min(max(budget, 32 << 20), 64 << 20))        # stay within v7x VMEM


def residual_fusion(x, w1, b1, w2, b2, ws, bs, *, tile_m=128, interpret=False):
    """x: [B, input_dim]; w*: (in, out); b*: (1, out). Returns f32 [B, output_dim]."""
    batch, input_dim = x.shape
    fusion_dim = w1.shape[1]
    output_dim = ws.shape[1]

    # Lane-dense padded dims (multiples of 128); batch tile multiple of 16 (bf16 sublanes).
    k_in = _round_up(input_dim, 128)
    k_f = _round_up(fusion_dim, 128)
    n_out = _round_up(output_dim, 128)
    tile_m = max(16, min(tile_m, _round_up(batch, 16)))
    m = _round_up(batch, tile_m)

    def pad2(a, rows, cols, dtype):
        return jnp.pad(a, ((0, rows - a.shape[0]), (0, cols - a.shape[1]))).astype(dtype)

    # bf16 matmul operands, f32 biases (elementwise stays f32).
    xp = pad2(x, m, k_in, jnp.bfloat16)
    w1p = pad2(w1, k_in, k_f, jnp.bfloat16)
    w2p = pad2(w2, k_f, n_out, jnp.bfloat16)
    wsp = pad2(ws, k_in, n_out, jnp.bfloat16)
    b1p = pad2(b1, 1, k_f, jnp.float32)
    b2p = pad2(b2, 1, n_out, jnp.float32)
    bsp = pad2(bs, 1, n_out, jnp.float32)

    grid = (m // tile_m,)

    def const_spec(shape):
        return pl.BlockSpec(shape, lambda i: (0,) * len(shape))

    out = pl.pallas_call(
        _residual_fusion_kernel,
        out_shape=jax.ShapeDtypeStruct((m, n_out), jnp.float32),
        grid=grid,
        in_specs=[
            pl.BlockSpec((tile_m, k_in), lambda i: (i, 0)),   # x: tiled over batch
            const_spec((k_in, k_f)),                          # W1 (VMEM-resident)
            const_spec((1, k_f)),                             # b1
            const_spec((k_f, n_out)),                         # W2
            const_spec((1, n_out)),                           # b2
            const_spec((k_in, n_out)),                        # Ws
            const_spec((1, n_out)),                           # bs
        ],
        out_specs=pl.BlockSpec((tile_m, n_out), lambda i: (i, 0)),
        compiler_params=pltpu.CompilerParams(
            dimension_semantics=("parallel",),
            vmem_limit_bytes=_vmem_budget_bytes(tile_m, k_in, k_f, n_out),
        ),
        interpret=interpret,
    )(xp, w1p, b1p, w2p, b2p, wsp, bsp)

    return out[:batch, :output_dim]


def init_params(key, input_dim, fusion_dim, output_dim):
    """Deterministic synthetic params (nn.Linear shapes, stored transposed: (in, out))."""
    ks = jax.random.split(key, 6)
    w1 = jax.random.normal(ks[0], (input_dim, fusion_dim), jnp.float32) * 0.1
    b1 = jax.random.normal(ks[1], (1, fusion_dim), jnp.float32) * 0.1
    w2 = jax.random.normal(ks[2], (fusion_dim, output_dim), jnp.float32) * 0.1
    b2 = jax.random.normal(ks[3], (1, output_dim), jnp.float32) * 0.1
    ws = jax.random.normal(ks[4], (input_dim, output_dim), jnp.float32) * 0.1
    bs = jax.random.normal(ks[5], (1, output_dim), jnp.float32) * 0.1
    return w1, b1, w2, b2, ws, bs


def reference_f32(x, w1, b1, w2, b2, ws, bs):
    residual = x @ ws + bs
    h = jnp.maximum(x @ w1 + b1, 0.0)
    return jnp.maximum(h @ w2 + b2 + residual, 0.0)


def reference_bf16_path(x, w1, b1, w2, b2, ws, bs):
    """Mirrors the kernel's precision path: bf16 matmul operands, f32 accumulate/elementwise."""
    dot = lambda a, b: jnp.dot(a.astype(jnp.bfloat16), b.astype(jnp.bfloat16),
                               preferred_element_type=jnp.float32)
    residual = dot(x, ws) + bs + b2
    h = jnp.maximum(dot(x, w1) + b1, 0.0)
    return jnp.maximum(dot(h, w2) + residual, 0.0)


if __name__ == "__main__":
    key = jax.random.PRNGKey(0)
    batch, input_dim, fusion_dim, output_dim = 8, 32, 64, 32

    k_x, k_p = jax.random.split(key)
    x = jax.random.normal(k_x, (batch, input_dim), jnp.float32)
    params = init_params(k_p, input_dim, fusion_dim, output_dim)

    out = residual_fusion(x, *params)
    out = jax.block_until_ready(out)
    assert out.shape == (batch, output_dim)

    # Tight check against a reference that follows the same bf16 matmul path.
    ref_bf16 = reference_bf16_path(x, *params)
    assert jnp.allclose(out, ref_bf16, atol=2e-3, rtol=2e-3), "mismatch vs bf16-path reference"

    # Loose sanity check against the full-f32 PyTorch-equivalent math.
    ref_f32 = reference_f32(x, *params)
    assert jnp.allclose(out, ref_f32, atol=5e-2, rtol=5e-2), "mismatch vs f32 reference"

    print("KERNEL_OK")
</pallas_src>

<mosaic_0001>
module attributes {stable_mosaic.version = 11 : i64} {
  func.func @_residual_fusion_kernel(%arg0: i32, %arg1: memref<16x128xbf16, #tpu.memory_space<vmem>>, %arg2: memref<128x128xbf16, #tpu.memory_space<vmem>>, %arg3: memref<1x128xf32, #tpu.memory_space<vmem>>, %arg4: memref<128x128xbf16, #tpu.memory_space<vmem>>, %arg5: memref<1x128xf32, #tpu.memory_space<vmem>>, %arg6: memref<128x128xbf16, #tpu.memory_space<vmem>>, %arg7: memref<1x128xf32, #tpu.memory_space<vmem>>, %arg8: memref<16x128xf32, #tpu.memory_space<vmem>>) attributes {dimension_semantics = [#tpu.dimension_semantics<parallel>], iteration_bounds = array<i64: 1>, scalar_prefetch = 0 : i64, scratch_operands = 0 : i64, tpu.core_type = #tpu.core_type<tc>, window_params = [{transform_indices = @transform_0, window_bounds = array<i64: 16, 128>}, {pipeline_mode = #tpu.pipeline_mode<synchronous>, transform_indices = @transform_1, window_bounds = array<i64: 128, 128>}, {pipeline_mode = #tpu.pipeline_mode<synchronous>, transform_indices = @transform_2, window_bounds = array<i64: 1, 128>}, {pipeline_mode = #tpu.pipeline_mode<synchronous>, transform_indices = @transform_3, window_bounds = array<i64: 128, 128>}, {pipeline_mode = #tpu.pipeline_mode<synchronous>, transform_indices = @transform_4, window_bounds = array<i64: 1, 128>}, {pipeline_mode = #tpu.pipeline_mode<synchronous>, transform_indices = @transform_5, window_bounds = array<i64: 128, 128>}, {pipeline_mode = #tpu.pipeline_mode<synchronous>, transform_indices = @transform_6, window_bounds = array<i64: 1, 128>}, {transform_indices = @transform_7, window_bounds = array<i64: 16, 128>}]} {
    %c0 = arith.constant 0 : index
    %c0_0 = arith.constant 0 : index
    %0 = vector.load %arg1[%c0, %c0_0] : memref<16x128xbf16, #tpu.memory_space<vmem>>, vector<16x128xbf16>
    %c0_1 = arith.constant 0 : index
    %c0_2 = arith.constant 0 : index
    %1 = vector.load %arg6[%c0_1, %c0_2] : memref<128x128xbf16, #tpu.memory_space<vmem>>, vector<128x128xbf16>
    %cst = arith.constant dense<0.000000e+00> : vector<16x128xf32>
    %2 = tpu.matmul %0, %1, %cst {dimension_numbers = #tpu.dot_dimension_numbers<[1], [0], [0], [1], [0, 0, 1, 1], [], []>} : vector<16x128xbf16>, vector<128x128xbf16>, vector<16x128xf32> -> vector<16x128xf32>
    %c0_3 = arith.constant 0 : index
    %c0_4 = arith.constant 0 : index
    %3 = vector.load %arg7[%c0_3, %c0_4] : memref<1x128xf32, #tpu.memory_space<vmem>>, vector<1x128xf32>
    %4 = vector.broadcast %3 : vector<1x128xf32> to vector<16x128xf32>
    %5 = arith.addf %2, %4 : vector<16x128xf32>
    %c0_5 = arith.constant 0 : index
    %c0_6 = arith.constant 0 : index
    %6 = vector.load %arg5[%c0_5, %c0_6] : memref<1x128xf32, #tpu.memory_space<vmem>>, vector<1x128xf32>
    %7 = vector.broadcast %6 : vector<1x128xf32> to vector<16x128xf32>
    %8 = arith.addf %5, %7 : vector<16x128xf32>
    %c0_7 = arith.constant 0 : index
    %c0_8 = arith.constant 0 : index
    %9 = vector.load %arg2[%c0_7, %c0_8] : memref<128x128xbf16, #tpu.memory_space<vmem>>, vector<128x128xbf16>
    %cst_9 = arith.constant dense<0.000000e+00> : vector<16x128xf32>
    %10 = tpu.matmul %0, %9, %cst_9 {dimension_numbers = #tpu.dot_dimension_numbers<[1], [0], [0], [1], [0, 0, 1, 1], [], []>} : vector<16x128xbf16>, vector<128x128xbf16>, vector<16x128xf32> -> vector<16x128xf32>
    %c0_10 = arith.constant 0 : index
    %c0_11 = arith.constant 0 : index
    %11 = vector.load %arg3[%c0_10, %c0_11] : memref<1x128xf32, #tpu.memory_space<vmem>>, vector<1x128xf32>
    %12 = vector.broadcast %11 : vector<1x128xf32> to vector<16x128xf32>
    %13 = arith.addf %10, %12 : vector<16x128xf32>
    %cst_12 = arith.constant 0.000000e+00 : f32
    %14 = vector.broadcast %cst_12 : f32 to vector<16x128xf32>
    %15 = arith.maximumf %13, %14 : vector<16x128xf32>
    %16 = arith.truncf %15 : vector<16x128xf32> to vector<16x128xbf16>
    %c0_13 = arith.constant 0 : index
    %c0_14 = arith.constant 0 : index
    %17 = vector.load %arg4[%c0_13, %c0_14] : memref<128x128xbf16, #tpu.memory_space<vmem>>, vector<128x128xbf16>
    %cst_15 = arith.constant dense<0.000000e+00> : vector<16x128xf32>
    %18 = tpu.matmul %16, %17, %cst_15 {dimension_numbers = #tpu.dot_dimension_numbers<[1], [0], [0], [1], [0, 0, 1, 1], [], []>} : vector<16x128xbf16>, vector<128x128xbf16>, vector<16x128xf32> -> vector<16x128xf32>
    %19 = arith.addf %18, %8 : vector<16x128xf32>
    %cst_16 = arith.constant 0.000000e+00 : f32
    %20 = vector.broadcast %cst_16 : f32 to vector<16x128xf32>
    %21 = arith.maximumf %19, %20 : vector<16x128xf32>
    %c0_17 = arith.constant 0 : index
    %c0_18 = arith.constant 0 : index
    %22 = vector.load %arg8[%c0_17, %c0_18] : memref<16x128xf32, #tpu.memory_space<vmem>>, vector<16x128xf32>
    tpu.vector_store %arg8[%c0_17, %c0_18], %21 {strides = array<i32>} : memref<16x128xf32, #tpu.memory_space<vmem>>, vector<16x128xf32>,
    return
  }
  func.func @transform_0(%arg0: i32) -> (i32, i32) {
    %c0_i32 = arith.constant 0 : i32
    %c0_i32_0 = arith.constant 0 : i32
    return %arg0, %c0_i32 : i32, i32
  }
  func.func @transform_1(%arg0: i32) -> (i32, i32) {
    %c0_i32 = arith.constant 0 : i32
    %c0_i32_0 = arith.constant 0 : i32
    %c0_i32_1 = arith.constant 0 : i32
    return %c0_i32, %c0_i32_0 : i32, i32
  }
  func.func @transform_2(%arg0: i32) -> (i32, i32) {
    %c0_i32 = arith.constant 0 : i32
    %c0_i32_0 = arith.constant 0 : i32
    %c0_i32_1 = arith.constant 0 : i32
    return %c0_i32, %c0_i32_0 : i32, i32
  }
  func.func @transform_3(%arg0: i32) -> (i32, i32) {
    %c0_i32 = arith.constant 0 : i32
    %c0_i32_0 = arith.constant 0 : i32
    %c0_i32_1 = arith.constant 0 : i32
    return %c0_i32, %c0_i32_0 : i32, i32
  }
  func.func @transform_4(%arg0: i32) -> (i32, i32) {
    %c0_i32 = arith.constant 0 : i32
    %c0_i32_0 = arith.constant 0 : i32
    %c0_i32_1 = arith.constant 0 : i32
    return %c0_i32, %c0_i32_0 : i32, i32
  }
  func.func @transform_5(%arg0: i32) -> (i32, i32) {
    %c0_i32 = arith.constant 0 : i32
    %c0_i32_0 = arith.constant 0 : i32
    %c0_i32_1 = arith.constant 0 : i32
    return %c0_i32, %c0_i32_0 : i32, i32
  }
  func.func @transform_6(%arg0: i32) -> (i32, i32) {
    %c0_i32 = arith.constant 0 : i32
    %c0_i32_0 = arith.constant 0 : i32
    %c0_i32_1 = arith.constant 0 : i32
    return %c0_i32, %c0_i32_0 : i32, i32
  }
  func.func @transform_7(%arg0: i32) -> (i32, i32) {
    %c0_i32 = arith.constant 0 : i32
    %c0_i32_0 = arith.constant 0 : i32
    return %arg0, %c0_i32 : i32, i32
  }
}

</mosaic_0001>

<bundles_post_ra>
// kernel: tpu_custom_call.1
= control target key start
LH: loop header
LB: loop body
LE: loop exit
PB: predicated region body
PF: predicated region fallthrough
CT: control target
= control target key end

     0   :  { %12 = vsyncpa [#allocation3], 0  ;;  %s908_s0 = inlined_call_operand.hbm [shape: bf16[16,128], index: 0, kind: input, shape index: {}]   ;;  %s909_s1 = inlined_call_operand.hbm [shape: bf16[128,128], index: 1, kind: input, shape index: {}]   ;;  %s910_s2 = inlined_call_operand.vmem [shape: f32[1,128], index: 2, kind: input, shape index: {}]   ;;  %s911_s3 = inlined_call_operand.hbm [shape: bf16[128,128], index: 3, kind: input, shape index: {}]   ;;  %s912_s4 = inlined_call_operand.vmem [shape: f32[1,128], index: 4, kind: input, shape index: {}]   ;;  %s913_s5 = inlined_call_operand.hbm [shape: bf16[128,128], index: 5, kind: input, shape index: {}]   ;;  %s914_s6 = inlined_call_operand.vmem [shape: f32[1,128], index: 6, kind: input, shape index: {}]   ;;  %s915_s7 = inlined_call_operand.hbm [shape: f32[16,128], index: 7, kind: output, shape index: {}]  }
   0x1   :  { %13 = vsyncpa [#allocation6], 0 }
   0x2   :  { %14 = vsyncpa [#allocation9], 0 }
   0x3   :  { %15 = vsyncpa [#allocation4], 0  ;;  %s732_s24 = smov [#allocation5]   ;;  %s733_s26 = smov [#allocation2]  }
   0x4   :  { %s33_s25 = sshll.u32 %s732_s24, 4  ;;  %s21_s27 = sshll.u32 %s733_s26, 4  ;;  %s34_s25 = int_to_ptr.vmem [resolvable:$true] %s33_s25  ;;  %s783_s27 = int_to_ptr.vmem [resolvable:$true] %s21_s27 }
   0x5   :  { %s614_s30 = scalar_lea.hbm %s909_s1, 1024 }
   0x6   :  { %p615_p0 = scmp.ne.s32.totalorder %s909_s1, %s614_s30  ;;  %p618_p1 = scmp.lt.u32.totalorder %s614_s30, %s909_s1 }
   0x8   :  { %p620_p2 = pnand %p618_p1, %p615_p0 }
   0xa   :  { %623 = shalt.err (!%p620_p2)
}
   0xb   :  { %s624_s12 = scalar_lea.vmem %s34_s25, 1024  ;;  %p629_p4 = scmp.lt.s32.totalorder %s34_s25, %s34_s25 }
   0xc   :  { %p625_p3 = scmp.ne.s32.totalorder %s34_s25, %s624_s12  ;;  %p630_p5 = scmp.lt.s32.totalorder %s624_s12, %s624_s12 }
   0xe   :  { %p631_p6 = por %p630_p5, %p629_p4 }
  0x10   :  { %p632_p7 = pnand %p631_p6, %p625_p3 }
  0x12   :  { %635 = shalt.err (!%p632_p7)
}
  0x13   :  { %s734_s13 = smov 64   ;;  %s735_s14 = smov 4  }
  0x14   :  { %39 = dma.hbm_to_vmem [thread:$0]  %s909_s1, 1024, %s34_s25, [#allocation6], %s734_s13, %s734_s13, %s735_s14  }
  0x15   :  { %s636_s19 = scalar_lea.hbm %s908_s0, 128 }
  0x16   :  { %p637_p8 = scmp.ne.s32.totalorder %s908_s0, %s636_s19  ;;  %p640_p9 = scmp.lt.u32.totalorder %s636_s19, %s908_s0 }
  0x18   :  { %p642_p10 = pnand %p640_p9, %p637_p8 }
  0x1a   :  { %645 = shalt.err (!%p642_p10)
}
  0x1b   :  { %s646_s24 = scalar_lea.vmem %s783_s27, 128  ;;  %p651_p12 = scmp.lt.s32.totalorder %s783_s27, %s783_s27 }
  0x1c   :  { %p647_p11 = scmp.ne.s32.totalorder %s783_s27, %s646_s24  ;;  %p652_p13 = scmp.lt.s32.totalorder %s646_s24, %s646_s24 }
  0x1e   :  { %p653_p0 = por %p652_p13, %p651_p12 }
  0x20   :  { %p654_p1 = pnand %p653_p0, %p647_p11 }
  0x22   :  { %657 = shalt.err (!%p654_p1)
}
  0x23   :  { %27 = dma.hbm_to_vmem [thread:$0]  %s908_s0, 128, %s783_s27, [#allocation3], %s734_s13, %s734_s13, %s735_s14  }
  0x24   :  { %s736_s26 = smov [#allocation7]   ;;  %s737_s29 = smov [#allocation8]  }
  0x25   :  { %s47_s28 = sshll.u32 %s736_s26, 4  ;;  %s61_s30 = sshll.u32 %s737_s29, 4  ;;  %s48_s28 = int_to_ptr.vmem [resolvable:$true] %s47_s28  ;;  %s820_s30 = int_to_ptr.vmem [resolvable:$true] %s61_s30 }
  0x26   :  { %s658_s10 = scalar_lea.hbm %s911_s3, 1024 }
  0x27   :  { %p659_p2 = scmp.ne.s32.totalorder %s911_s3, %s658_s10  ;;  %p662_p3 = scmp.lt.u32.totalorder %s658_s10, %s911_s3 }
  0x29   :  { %p664_p4 = pnand %p662_p3, %p659_p2 }
  0x2b   :  { %667 = shalt.err (!%p664_p4)
}
  0x2c   :  { %s668_s0 = scalar_lea.vmem %s48_s28, 1024  ;;  %p673_p6 = scmp.lt.s32.totalorder %s48_s28, %s48_s28 }
  0x2d   :  { %p669_p5 = scmp.ne.s32.totalorder %s48_s28, %s668_s0  ;;  %p674_p7 = scmp.lt.s32.totalorder %s668_s0, %s668_s0 }
  0x2f   :  { %p675_p8 = por %p674_p7, %p673_p6 }
  0x31   :  { %p676_p9 = pnand %p675_p8, %p669_p5 }
  0x33   :  { %679 = shalt.err (!%p676_p9)
}
  0x34   :  { %53 = dma.hbm_to_vmem [thread:$0]  %s911_s3, 1024, %s48_s28, [#allocation6], %s734_s13, %s734_s13, %s735_s14  }
  0x35   :  { %s680_s20 = scalar_lea.hbm %s913_s5, 1024 }
  0x36   :  { %p681_p10 = scmp.ne.s32.totalorder %s913_s5, %s680_s20  ;;  %p684_p11 = scmp.lt.u32.totalorder %s680_s20, %s913_s5 }
  0x38   :  { %p686_p12 = pnand %p684_p11, %p681_p10 }
  0x3a   :  { %689 = shalt.err (!%p686_p12)
}
  0x3b   :  { %s690_s1 = scalar_lea.vmem %s820_s30, 1024  ;;  %p695_p0 = scmp.lt.s32.totalorder %s820_s30, %s820_s30 }
  0x3c   :  { %p691_p13 = scmp.ne.s32.totalorder %s820_s30, %s690_s1  ;;  %p696_p1 = scmp.lt.s32.totalorder %s690_s1, %s690_s1 }
  0x3e   :  { %p697_p2 = por %p696_p1, %p695_p0 }
  0x40   :  { %p698_p3 = pnand %p697_p2, %p691_p13 }
  0x42   :  { %701 = shalt.err (!%p698_p3)
}
  0x43   :  { %67 = dma.hbm_to_vmem [thread:$0]  %s913_s5, 1024, %s820_s30, [#allocation9], %s734_s13, %s734_s13, %s735_s14  }
  0x44   :  { %724 = dma.done.wait [#allocation3], 128  }
  0x45   :  { %725 = vsyncadd [#allocation3], 4294967168 }
  0x46   :  { %726 = dma.done.wait [#allocation6], 2048  }
  0x47   :  { %727 = vsyncadd [#allocation6], 4294965248 }
  0x48   :  { %728 = dma.done.wait [#allocation9], 1024  }
  0x49   :  { %729 = vsyncadd [#allocation9], 4294966272  ;;  %v738_v0 = vmov 0.0   ;;  %vm739_vm0 = vmmov 0   ;;  %v589_v1 = vld [vmem:[#allocation5] sm:$0xff]   ;;  %v590_v2 = vld [vmem:[#allocation5 + $0x8] sm:$0xff]  }
  0x4a   :  { %530 = vmatprep.subr.bf16.mxu1 %v738_v0  ;;  %546 = vmatprep.mubr.msk.bf16.mxu1 %vm739_vm0, %v738_v0  ;;  %v591_v3 = vld [vmem:[#allocation5 + $0x10] sm:$0xff]   ;;  %v598_v4 = vld [vmem:[#allocation8] sm:$0xff]   ;;  %v592_v5 = vld [vmem:[#allocation5 + $0x18] sm:$0xff]  }
  0x4b   :  { %510 = vmatprep.subr.bf16.mxu0 %v738_v0  ;;  %526 = vmatprep.mubr.msk.bf16.mxu0 %vm739_vm0, %v738_v0  ;;  %v599_v6 = vld [vmem:[#allocation8 + $0x8] sm:$0xff]   ;;  %v593_v7 = vld [vmem:[#allocation5 + $0x20] sm:$0xff]   ;;  %v600_v8 = vld [vmem:[#allocation8 + $0x10] sm:$0xff]  }
  0x4c   :  { %531 = vmatpush3.bf16.msra.mxu1 %v589_v1  ;;  %511 = vmatpush3.bf16.msra.mxu0 %v598_v4  ;;  %v594_v9 = vld [vmem:[#allocation5 + $0x28] sm:$0xff]   ;;  %v601_v10 = vld [vmem:[#allocation8 + $0x18] sm:$0xff]   ;;  %v595_v11 = vld [vmem:[#allocation5 + $0x30] sm:$0xff]  }
  0x4d   :  { %532 = vmatprep.subr.bf16.mxu1 %v738_v0  ;;  %512 = vmatprep.subr.bf16.mxu0 %v738_v0  ;;  %v602_v12 = vld [vmem:[#allocation8 + $0x20] sm:$0xff]   ;;  %v596_v13 = vld [vmem:[#allocation5 + $0x38] sm:$0xff]   ;;  %v603_v14 = vld [vmem:[#allocation8 + $0x28] sm:$0xff]  }
  0x4e   :  { %v597_v15 = vld [vmem:[#allocation2] sm:$0xff]   ;;  %v604_v16 = vld [vmem:[#allocation8 + $0x30] sm:$0xff]   ;;  %v606_v18 = vld [vmem:[#allocation7] sm:$0xff]  }
  0x4f   :  { %v605_v17 = vld [vmem:[#allocation8 + $0x38] sm:$0xff]   ;;  %v607_v19 = vld [vmem:[#allocation7 + $0x8] sm:$0xff]   ;;  %v608_v20 = vld [vmem:[#allocation7 + $0x10] sm:$0xff]  }
  0x50   :  { %533 = vmatpush3.bf16.msra.mxu1 %v590_v2  ;;  %513 = vmatpush3.bf16.msra.mxu0 %v599_v6  ;;  %v609_v21 = vld [vmem:[#allocation7 + $0x18] sm:$0xff]   ;;  %v610_v22 = vld [vmem:[#allocation7 + $0x20] sm:$0xff]   ;;  %v611_v23 = vld [vmem:[#allocation7 + $0x28] sm:$0xff]  }
  0x51   :  { %534 = vmatprep.subr.bf16.mxu1 %v738_v0  ;;  %514 = vmatprep.subr.bf16.mxu0 %v738_v0  ;;  %v612_v24 = vld [vmem:[#allocation7 + $0x30] sm:$0xff]   ;;  %v613_v25 = vld [vmem:[#allocation7 + $0x38] sm:$0xff]  }
  0x52   :  { %v466_v26 = vld [vmem:[%s910_s2] ss:$0 sm:$0xff]  ;;  %s740_s2 = smov [#allocation10]  }
  0x53   :  { %v455_v36 = vld [vmem:[%s914_s6] ss:$0 sm:$0xff]  ;;  %s441_s30 = sshll.u32 %s740_s2, 4  ;;  %s442_s30 = int_to_ptr.vmem [resolvable:$true] %s441_s30 }
  0x54   :  { %535 = vmatpush3.bf16.msra.mxu1 %v591_v3  ;;  %515 = vmatpush3.bf16.msra.mxu0 %v600_v8  ;;  %v465_v37 = vld [vmem:[%s912_s4] ss:$0 sm:$0xff]  ;;  %s702_s8 = scalar_lea.vmem %s442_s30, 256  ;;  %p707_p5 = scmp.lt.s32.totalorder %s442_s30, %s442_s30 }
  0x55   :  { %536 = vmatprep.subr.bf16.mxu1 %v738_v0  ;;  %516 = vmatprep.subr.bf16.mxu0 %v738_v0  ;;  %v570_v38 = vadd.f32 %v465_v37, %v455_v36  ;;  %p703_p4 = scmp.ne.s32.totalorder %s442_s30, %s702_s8  ;;  %p708_p6 = scmp.lt.s32.totalorder %s702_s8, %s702_s8 }
  0x57   :  { %p709_p7 = por %p708_p6, %p707_p5 }
  0x58   :  { %537 = vmatpush3.bf16.msra.mxu1 %v592_v5  ;;  %517 = vmatpush3.bf16.msra.mxu0 %v601_v10 }
  0x59   :  { %538 = vmatprep.subr.bf16.mxu1 %v738_v0  ;;  %518 = vmatprep.subr.bf16.mxu0 %v738_v0  ;;  %p710_p8 = pnand %p709_p7, %p703_p4 }
  0x5c   :  { %539 = vmatpush3.bf16.msra.mxu1 %v593_v7  ;;  %519 = vmatpush3.bf16.msra.mxu0 %v602_v12 }
  0x5d   :  { %540 = vmatprep.subr.bf16.mxu1 %v738_v0  ;;  %520 = vmatprep.subr.bf16.mxu0 %v738_v0 }
  0x60   :  { %541 = vmatpush3.bf16.msra.mxu1 %v594_v9  ;;  %521 = vmatpush3.bf16.msra.mxu0 %v603_v14 }
  0x61   :  { %542 = vmatprep.subr.bf16.mxu1 %v738_v0  ;;  %522 = vmatprep.subr.bf16.mxu0 %v738_v0 }
  0x64   :  { %543 = vmatpush3.bf16.msra.mxu1 %v595_v11  ;;  %523 = vmatpush3.bf16.msra.mxu0 %v604_v16 }
  0x65   :  { %544 = vmatprep.subr.bf16.mxu1 %v738_v0  ;;  %524 = vmatprep.subr.bf16.mxu0 %v738_v0 }
  0x68   :  { %545 = vmatpush3.bf16.msra.mxu1 %v596_v13  ;;  %525 = vmatpush3.bf16.msra.mxu0 %v605_v17 }
  0x69   :  { %550 = vmatprep.subr.bf16.mxu0 %v738_v0 }
  0x6b   :  { %547 = vmatmul.mubr.bf16.vlgmr.msra.gmra.mrb[0].mxu1 %v597_v15  ;;  %527 = vmatmul.mubr.bf16.vlgmr.msra.gmra.mrb[0].mxu0 %v597_v15 }
  0x6c   :  { %551 = vmatpush3.bf16.msra.mxu0 %v606_v18  ;;  %566 = vmatprep.mubr.msk.bf16.mxu0 %vm739_vm0, %v738_v0 }
  0x6d   :  { %552 = vmatprep.subr.bf16.mxu0 %v738_v0 }
  0x70   :  { %553 = vmatpush3.bf16.msra.mxu0 %v607_v19 }
  0x71   :  { %554 = vmatprep.subr.bf16.mxu0 %v738_v0 }
  0x74   :  { %555 = vmatpush3.bf16.msra.mxu0 %v608_v20 }
  0x75   :  { %556 = vmatprep.subr.bf16.mxu0 %v738_v0 }
  0x78   :  { %557 = vmatpush3.bf16.msra.mxu0 %v609_v21 }
  0x79   :  { %558 = vmatprep.subr.bf16.mxu0 %v738_v0 }
  0x7c   :  { %559 = vmatpush3.bf16.msra.mxu0 %v610_v22 }
  0x7d   :  { %560 = vmatprep.subr.bf16.mxu0 %v738_v0 }
  0x80   :  { %561 = vmatpush3.bf16.msra.mxu0 %v611_v23 }
  0x81   :  { %562 = vmatprep.subr.bf16.mxu0 %v738_v0 }
  0x84   :  { %563 = vmatpush3.bf16.msra.mxu0 %v612_v24 }
  0x85   :  { %564 = vmatprep.subr.bf16.mxu0 %v738_v0 }
  0x88   :  { %565 = vmatpush3.bf16.msra.mxu0 %v613_v25 }
 0x13e   :  { %v317_v27 = vpop.f32.mrb[0].mxu1 }
 0x13f   :  { %v318_v28 = vadd.f32 %v466_v26, %v317_v27  ;;  %v548_v29 = vpop.f32.mrb[1].mxu1 }
 0x140   :  { %v320_v30 = vpop.f32.mrb[2].mxu1 }
 0x141   :  { %v321_v31 = vadd.f32 %v466_v26, %v320_v30  ;;  %v549_v32 = vpop.f32.mrb[3].mxu1  ;;  %v324_v33 = vmax.f32 %v318_v28, 0.0 }
 0x143   :  { %v325_v34 = vmax.f32 %v321_v31, 0.0 }
 0x145   :  { %v326_v35 = vpack.c.bf16 %v325_v34, %v324_v33 }
 0x147   :  { %567 = vmatmul.mubr.bf16.vlgmr.msra.gmra.mrb[0].mxu0 %v326_v35 }
 0x21a   :  { %v425_v39 = vpop.f32.mrb[0].mxu0 }
 0x21b   :  { %v571_v40 = vadd.f32 %v570_v38, %v425_v39  ;;  %v568_v41 = vpop.f32.mrb[1].mxu0 }
 0x21c   :  { %v428_v42 = vpop.f32.mrb[2].mxu0 }
 0x21d   :  { %v432_v43 = vmax.f32 %v571_v40, 0.0  ;;  %v573_v44 = vadd.f32 %v570_v38, %v428_v42  ;;  %v569_v45 = vpop.f32.mrb[3].mxu0 }
 0x21f   :  { %434 = vst [vmem:[#allocation10] sm:$0xff] %v432_v43  ;;  %v433_v46 = vmax.f32 %v573_v44, 0.0 }
 0x221   :  { %435 = vst [vmem:[#allocation10 + $0x8] sm:$0xff] %v433_v46 }
 0x222   :  { %713 = shalt.err (!%p710_p8)
}
 0x223   :  { %s714_s9 = scalar_lea.hbm %s915_s7, 256 }
 0x224   :  { %p715_p9 = scmp.ne.s32.totalorder %s915_s7, %s714_s9  ;;  %p718_p10 = scmp.lt.u32.totalorder %s714_s9, %s915_s7 }
 0x226   :  { %p720_p11 = pnand %p718_p10, %p715_p9 }
 0x228   :  { %723 = shalt.err (!%p720_p11)
}
 0x229   :  { %s741_s16 = smov 128   ;;  %s742_s0 = smov 8  }
 0x22a   :  { %447 = dma.vmem_to_hbm [thread:$0]  %s442_s30, 256, %s915_s7, [#allocation4], %s741_s16, %s741_s16, %s742_s0  }
 0x22b   :  { %730 = dma.done.wait [#allocation4], 256  }
 0x22c   :  { %731 = vsyncadd [#allocation4], 4294967040 }
 0x22d   :  { %451 = vsyncpa [#allocation3], 1 }
 0x22e   :  { %452 = vsyncpa [#allocation6], 1 }
 0x22f   :  { %453 = vsyncpa [#allocation9], 1 }
 0x230   :  { %454 = vsyncpa [#allocation4], 1 }

</bundles_post_ra>
